<compile_context>
chip_gen: v5e
topology: v5e:2x2
jax: 0.10.0
libtpu: 0.0.40
codegen_flags: <defaults>
</compile_context>

<pallas_src>
import jax
import jax.numpy as jnp
from jax.experimental import pallas as pl
from jax.experimental.pallas import tpu as pltpu


def dqn_kernel(x_ref,
               w1_ref, b1_ref,
               w2_ref, b2_ref,
               w3_ref, b3_ref,
               w4_ref, b4_ref,
               o_ref):
    # Batch on lanes (last axis), features on sublanes.
    x = x_ref[...]                                               # [1, TB] f32

    # fc1 (K=1): outer product -> pure VPU broadcast-multiply, skip the MXU.
    h = jnp.maximum(w1_ref[...] * x + b1_ref[...], 0.0)         # [16, TB] f32

    # fc2: [32,16] @ [16,TB] on the MXU.  bf16 operands (weights pre-cast in
    # the wrapper), f32 accumulation.
    h = jnp.dot(w2_ref[...], h.astype(jnp.bfloat16),
                preferred_element_type=jnp.float32)
    h = jnp.maximum(h + b2_ref[...], 0.0)                        # [32, TB] f32

    # fc3: [16,32] @ [32,TB] on the MXU.
    h = jnp.dot(w3_ref[...], h.astype(jnp.bfloat16),
                preferred_element_type=jnp.float32)
    h = jnp.maximum(h + b3_ref[...], 0.0)                        # [16, TB] f32

    # fc4 (N=1): VPU multiply + sublane (XLU) reduce instead of a degenerate
    # MXU dot.  No activation on the last layer.
    out = jnp.sum(w4_ref[...] * h, axis=0, keepdims=True) + b4_ref[...]
    o_ref[...] = out.astype(o_ref.dtype)                         # [1, TB]


def _round_up(n, m):
    return ((n + m - 1) // m) * m


def _pick_tile_b(B, cap=16384):
    # Lane-dense (multiple of 128); at least 2 grid steps whenever B >= 256 so
    # both v7x TensorCores get work; capped so the per-tile f32 working set
    # stays well inside the v5e 16 MiB scoped-VMEM default.
    t = _round_up(pl.cdiv(B, 2), 128)
    return max(128, min(t, cap))


def reference_forward(x, params):
    h = x.astype(jnp.float32)
    for name in ("fc1", "fc2", "fc3"):
        w, b = params[name]
        h = jnp.maximum(h @ w + b, 0.0)
    w, b = params["fc4"]
    return h @ w + b


def dqn_forward(x, params, *, tile_b=None, min_pallas_batch=512):
    """x: [B, 1] float32 (PyTorch layout). params[name] = (w [in,out], b [1,out])."""
    B = x.shape[0]

    # Tiny batches: the whole MLP is ~1-2 us of compute; fused XLA beats the
    # pallas_call + layout plumbing overhead.  Keep the Pallas path for large
    # evaluation / replay-buffer sweeps.
    if B < min_pallas_batch:
        return reference_forward(x, params)

    if tile_b is None:
        tile_b = _pick_tile_b(B)
    tile_b = max(128, (tile_b // 128) * 128)          # keep tiles lane-dense
    grid = (pl.cdiv(B, tile_b),)                      # ragged last block OK

    # Batch-on-lanes input: (B, 1) -> (1, B) is a free contiguous reshape.
    x_t = x.astype(jnp.float32).reshape(1, B)

    w1, b1 = params["fc1"]
    w2, b2 = params["fc2"]
    w3, b3 = params["fc3"]
    w4, b4 = params["fc4"]
    w1_t = w1.T.astype(jnp.float32)                  # [16, 1]  VPU layer, f32
    w2_t = w2.T.astype(jnp.bfloat16)                 # [32, 16] MXU operand
    w3_t = w3.T.astype(jnp.bfloat16)                 # [16, 32] MXU operand
    w4_c = w4.astype(jnp.float32)                    # [16, 1]  VPU layer, f32
    b1_c = b1.reshape(-1, 1).astype(jnp.float32)     # [16, 1]
    b2_c = b2.reshape(-1, 1).astype(jnp.float32)     # [32, 1]
    b3_c = b3.reshape(-1, 1).astype(jnp.float32)     # [16, 1]
    b4_c = b4.reshape(1, 1).astype(jnp.float32)      # [1, 1]

    def const_spec(a):
        # Whole-array block, grid-invariant (fetched once, no re-DMA).
        return pl.BlockSpec(a.shape, lambda i: (0, 0))

    out_t = pl.pallas_call(
        dqn_kernel,
        out_shape=jax.ShapeDtypeStruct((1, B), jnp.float32),
        grid_spec=pl.GridSpec(
            grid=grid,
            in_specs=[
                pl.BlockSpec((1, tile_b), lambda i: (0, i)),     # x column tile
                const_spec(w1_t), const_spec(b1_c),
                const_spec(w2_t), const_spec(b2_c),
                const_spec(w3_t), const_spec(b3_c),
                const_spec(w4_c), const_spec(b4_c),
            ],
            out_specs=pl.BlockSpec((1, tile_b), lambda i: (0, i)),
        ),
        compiler_params=pltpu.CompilerParams(
            dimension_semantics=("parallel",)),       # batch tiles shard across TCs
    )(x_t, w1_t, b1_c, w2_t, b2_c, w3_t, b3_c, w4_c, b4_c)

    return out_t.reshape(B, 1)                        # free reshape back to [B, 1]


def init_params(key):
    """Deterministic synthetic parameters matching DQN's layer shapes."""
    sizes = [("fc1", 1, 16), ("fc2", 16, 32), ("fc3", 32, 16), ("fc4", 16, 1)]
    params = {}
    for name, fan_in, fan_out in sizes:
        key, kw, kb = jax.random.split(key, 3)
        bound = 1.0 / jnp.sqrt(jnp.float32(fan_in))   # PyTorch default init range
        w = jax.random.uniform(kw, (fan_in, fan_out), jnp.float32, -bound, bound)
        b = jax.random.uniform(kb, (1, fan_out), jnp.float32, -bound, bound)
        params[name] = (w, b)
    return params


if __name__ == "__main__":
    key = jax.random.PRNGKey(0)
    kx, kp = jax.random.split(key)
    params = init_params(kp)

    # Even two-step grid (2 x 512) so both v7x TensorCores get work.
    B = 1024
    x = jax.random.normal(kx, (B, 1), jnp.float32)
    out = jax.block_until_ready(dqn_forward(x, params, min_pallas_batch=0))
    ref = reference_forward(x, params)
    assert out.shape == (B, 1)
    # bf16 MXU operands (f32 accumulation) -> loosened tolerance vs f32 ref.
    assert jnp.allclose(out, ref, atol=3e-2, rtol=3e-2)

    # Ragged batch: last block masked by Pallas, no wrapper-side padding.
    B2 = 1000
    x2 = jax.random.normal(kx, (B2, 1), jnp.float32)
    out2 = jax.block_until_ready(dqn_forward(x2, params, min_pallas_batch=0))
    ref2 = reference_forward(x2, params)
    assert out2.shape == (B2, 1)
    assert jnp.allclose(out2, ref2, atol=3e-2, rtol=3e-2)

    # Tiny batch takes the fused-XLA dispatch path (bit-exact f32).
    x3 = jax.random.normal(kx, (10, 1), jnp.float32)
    out3 = jax.block_until_ready(dqn_forward(x3, params))
    ref3 = reference_forward(x3, params)
    assert out3.shape == (10, 1)
    assert jnp.allclose(out3, ref3, atol=1e-5, rtol=1e-5)

    print("KERNEL_OK")
</pallas_src>

<mosaic_0001>
module attributes {stable_mosaic.version = 11 : i64} {
  func.func @dqn_kernel(%arg0: i32, %arg1: memref<1x512xf32, #tpu.memory_space<vmem>>, %arg2: memref<16x1xf32, #tpu.memory_space<vmem>>, %arg3: memref<16x1xf32, #tpu.memory_space<vmem>>, %arg4: memref<32x16xbf16, #tpu.memory_space<vmem>>, %arg5: memref<32x1xf32, #tpu.memory_space<vmem>>, %arg6: memref<16x32xbf16, #tpu.memory_space<vmem>>, %arg7: memref<16x1xf32, #tpu.memory_space<vmem>>, %arg8: memref<16x1xf32, #tpu.memory_space<vmem>>, %arg9: memref<1x1xf32, #tpu.memory_space<vmem>>, %arg10: memref<1x512xf32, #tpu.memory_space<vmem>>) attributes {dimension_semantics = [#tpu.dimension_semantics<parallel>], iteration_bounds = array<i64: 2>, scalar_prefetch = 0 : i64, scratch_operands = 0 : i64, tpu.core_type = #tpu.core_type<tc>, window_params = [{transform_indices = @transform_0, window_bounds = array<i64: 1, 512>}, {pipeline_mode = #tpu.pipeline_mode<synchronous>, transform_indices = @transform_1, window_bounds = array<i64: 16, 1>}, {pipeline_mode = #tpu.pipeline_mode<synchronous>, transform_indices = @transform_2, window_bounds = array<i64: 16, 1>}, {pipeline_mode = #tpu.pipeline_mode<synchronous>, transform_indices = @transform_3, window_bounds = array<i64: 32, 16>}, {pipeline_mode = #tpu.pipeline_mode<synchronous>, transform_indices = @transform_4, window_bounds = array<i64: 32, 1>}, {pipeline_mode = #tpu.pipeline_mode<synchronous>, transform_indices = @transform_5, window_bounds = array<i64: 16, 32>}, {pipeline_mode = #tpu.pipeline_mode<synchronous>, transform_indices = @transform_6, window_bounds = array<i64: 16, 1>}, {pipeline_mode = #tpu.pipeline_mode<synchronous>, transform_indices = @transform_7, window_bounds = array<i64: 16, 1>}, {pipeline_mode = #tpu.pipeline_mode<synchronous>, transform_indices = @transform_8, window_bounds = array<i64: 1, 1>}, {transform_indices = @transform_9, window_bounds = array<i64: 1, 512>}]} {
    %c0 = arith.constant 0 : index
    %c0_0 = arith.constant 0 : index
    %0 = vector.load %arg1[%c0, %c0_0] : memref<1x512xf32, #tpu.memory_space<vmem>>, vector<1x512xf32>
    %c0_1 = arith.constant 0 : index
    %c0_2 = arith.constant 0 : index
    %1 = vector.load %arg2[%c0_1, %c0_2] : memref<16x1xf32, #tpu.memory_space<vmem>>, vector<16x1xf32>
    %2 = vector.broadcast %1 : vector<16x1xf32> to vector<16x512xf32>
    %3 = vector.broadcast %0 : vector<1x512xf32> to vector<16x512xf32>
    %4 = arith.mulf %2, %3 : vector<16x512xf32>
    %c0_3 = arith.constant 0 : index
    %c0_4 = arith.constant 0 : index
    %5 = vector.load %arg3[%c0_3, %c0_4] : memref<16x1xf32, #tpu.memory_space<vmem>>, vector<16x1xf32>
    %6 = vector.broadcast %5 : vector<16x1xf32> to vector<16x512xf32>
    %7 = arith.addf %4, %6 : vector<16x512xf32>
    %cst = arith.constant 0.000000e+00 : f32
    %8 = vector.broadcast %cst : f32 to vector<16x512xf32>
    %9 = arith.maximumf %7, %8 : vector<16x512xf32>
    %c0_5 = arith.constant 0 : index
    %c0_6 = arith.constant 0 : index
    %10 = vector.load %arg4[%c0_5, %c0_6] : memref<32x16xbf16, #tpu.memory_space<vmem>>, vector<32x16xbf16>
    %11 = arith.truncf %9 : vector<16x512xf32> to vector<16x512xbf16>
    %cst_7 = arith.constant dense<0.000000e+00> : vector<32x512xf32>
    %12 = tpu.matmul %10, %11, %cst_7 {dimension_numbers = #tpu.dot_dimension_numbers<[1], [0], [0], [1], [0, 0, 1, 1], [], []>} : vector<32x16xbf16>, vector<16x512xbf16>, vector<32x512xf32> -> vector<32x512xf32>
    %c0_8 = arith.constant 0 : index
    %c0_9 = arith.constant 0 : index
    %13 = vector.load %arg5[%c0_8, %c0_9] : memref<32x1xf32, #tpu.memory_space<vmem>>, vector<32x1xf32>
    %14 = vector.broadcast %13 : vector<32x1xf32> to vector<32x512xf32>
    %15 = arith.addf %12, %14 : vector<32x512xf32>
    %cst_10 = arith.constant 0.000000e+00 : f32
    %16 = vector.broadcast %cst_10 : f32 to vector<32x512xf32>
    %17 = arith.maximumf %15, %16 : vector<32x512xf32>
    %c0_11 = arith.constant 0 : index
    %c0_12 = arith.constant 0 : index
    %18 = vector.load %arg6[%c0_11, %c0_12] : memref<16x32xbf16, #tpu.memory_space<vmem>>, vector<16x32xbf16>
    %19 = arith.truncf %17 : vector<32x512xf32> to vector<32x512xbf16>
    %cst_13 = arith.constant dense<0.000000e+00> : vector<16x512xf32>
    %20 = tpu.matmul %18, %19, %cst_13 {dimension_numbers = #tpu.dot_dimension_numbers<[1], [0], [0], [1], [0, 0, 1, 1], [], []>} : vector<16x32xbf16>, vector<32x512xbf16>, vector<16x512xf32> -> vector<16x512xf32>
    %c0_14 = arith.constant 0 : index
    %c0_15 = arith.constant 0 : index
    %21 = vector.load %arg7[%c0_14, %c0_15] : memref<16x1xf32, #tpu.memory_space<vmem>>, vector<16x1xf32>
    %22 = vector.broadcast %21 : vector<16x1xf32> to vector<16x512xf32>
    %23 = arith.addf %20, %22 : vector<16x512xf32>
    %cst_16 = arith.constant 0.000000e+00 : f32
    %24 = vector.broadcast %cst_16 : f32 to vector<16x512xf32>
    %25 = arith.maximumf %23, %24 : vector<16x512xf32>
    %c0_17 = arith.constant 0 : index
    %c0_18 = arith.constant 0 : index
    %26 = vector.load %arg8[%c0_17, %c0_18] : memref<16x1xf32, #tpu.memory_space<vmem>>, vector<16x1xf32>
    %27 = vector.broadcast %26 : vector<16x1xf32> to vector<16x512xf32>
    %28 = arith.mulf %27, %25 : vector<16x512xf32>
    %cst_19 = arith.constant dense<0.000000e+00> : vector<512xf32>
    %29 = vector.multi_reduction <add>, %28, %cst_19 [0] : vector<16x512xf32> to vector<512xf32>
    %30 = vector.shape_cast %29 : vector<512xf32> to vector<1x512xf32>
    %c0_20 = arith.constant 0 : index
    %c0_21 = arith.constant 0 : index
    %31 = vector.load %arg9[%c0_20, %c0_21] : memref<1x1xf32, #tpu.memory_space<vmem>>, vector<1x1xf32>
    %32 = vector.broadcast %31 : vector<1x1xf32> to vector<1x512xf32>
    %33 = arith.addf %30, %32 : vector<1x512xf32>
    %c0_22 = arith.constant 0 : index
    %c0_23 = arith.constant 0 : index
    %34 = vector.load %arg10[%c0_22, %c0_23] : memref<1x512xf32, #tpu.memory_space<vmem>>, vector<1x512xf32>
    tpu.vector_store %arg10[%c0_22, %c0_23], %33 {strides = array<i32>} : memref<1x512xf32, #tpu.memory_space<vmem>>, vector<1x512xf32>,
    return
  }
  func.func @transform_0(%arg0: i32) -> (i32, i32) {
    %c0_i32 = arith.constant 0 : i32
    %c0_i32_0 = arith.constant 0 : i32
    return %c0_i32, %arg0 : i32, i32
  }
  func.func @transform_1(%arg0: i32) -> (i32, i32) {
    %c0_i32 = arith.constant 0 : i32
    %c0_i32_0 = arith.constant 0 : i32
    %c0_i32_1 = arith.constant 0 : i32
    return %c0_i32, %c0_i32_0 : i32, i32
  }
  func.func @transform_2(%arg0: i32) -> (i32, i32) {
    %c0_i32 = arith.constant 0 : i32
    %c0_i32_0 = arith.constant 0 : i32
    %c0_i32_1 = arith.constant 0 : i32
    return %c0_i32, %c0_i32_0 : i32, i32
  }
  func.func @transform_3(%arg0: i32) -> (i32, i32) {
    %c0_i32 = arith.constant 0 : i32
    %c0_i32_0 = arith.constant 0 : i32
    %c0_i32_1 = arith.constant 0 : i32
    return %c0_i32, %c0_i32_0 : i32, i32
  }
  func.func @transform_4(%arg0: i32) -> (i32, i32) {
    %c0_i32 = arith.constant 0 : i32
    %c0_i32_0 = arith.constant 0 : i32
    %c0_i32_1 = arith.constant 0 : i32
    return %c0_i32, %c0_i32_0 : i32, i32
  }
  func.func @transform_5(%arg0: i32) -> (i32, i32) {
    %c0_i32 = arith.constant 0 : i32
    %c0_i32_0 = arith.constant 0 : i32
    %c0_i32_1 = arith.constant 0 : i32
    return %c0_i32, %c0_i32_0 : i32, i32
  }
  func.func @transform_6(%arg0: i32) -> (i32, i32) {
    %c0_i32 = arith.constant 0 : i32
    %c0_i32_0 = arith.constant 0 : i32
    %c0_i32_1 = arith.constant 0 : i32
    return %c0_i32, %c0_i32_0 : i32, i32
  }
  func.func @transform_7(%arg0: i32) -> (i32, i32) {
    %c0_i32 = arith.constant 0 : i32
    %c0_i32_0 = arith.constant 0 : i32
    %c0_i32_1 = arith.constant 0 : i32
    return %c0_i32, %c0_i32_0 : i32, i32
  }
  func.func @transform_8(%arg0: i32) -> (i32, i32) {
    %c0_i32 = arith.constant 0 : i32
    %c0_i32_0 = arith.constant 0 : i32
    %c0_i32_1 = arith.constant 0 : i32
    return %c0_i32, %c0_i32_0 : i32, i32
  }
  func.func @transform_9(%arg0: i32) -> (i32, i32) {
    %c0_i32 = arith.constant 0 : i32
    %c0_i32_0 = arith.constant 0 : i32
    return %c0_i32, %arg0 : i32, i32
  }
}

</mosaic_0001>

<bundles_post_ra>
// kernel: tpu_custom_call.1
= control target key start
LH: loop header
LB: loop body
LE: loop exit
PB: predicated region body
PF: predicated region fallthrough
CT: control target
= control target key end

     0   :  { %s1117_s0 = inlined_call_operand.vmem [shape: f32[1,1024], index: 0, kind: input, shape index: {}]   ;;  %s1118_s1 = inlined_call_operand.vmem [shape: f32[16,1], index: 1, kind: input, shape index: {}]   ;;  %s1119_s2 = inlined_call_operand.vmem [shape: f32[16,1], index: 2, kind: input, shape index: {}]   ;;  %s1120_s3 = inlined_call_operand.vmem [shape: bf16[32,16], index: 3, kind: input, shape index: {}]   ;;  %s1121_s4 = inlined_call_operand.vmem [shape: f32[32,1], index: 4, kind: input, shape index: {}]   ;;  %s1122_s5 = inlined_call_operand.vmem [shape: bf16[16,32], index: 5, kind: input, shape index: {}]   ;;  %s1123_s6 = inlined_call_operand.vmem [shape: f32[16,1], index: 6, kind: input, shape index: {}]   ;;  %s1124_s7 = inlined_call_operand.vmem [shape: f32[16,1], index: 7, kind: input, shape index: {}]   ;;  %s1125_s8 = inlined_call_operand.<no memory space> [shape: f32[1,1], index: 8, kind: input, shape index: {}]   ;;  %s1126_s9 = inlined_call_operand.hbm [shape: f32[1,1024], index: 9, kind: output, shape index: {}]  }
   0x1   :  { %v14_v0 = vstv %s1125_s8 }
   0x2   :  { %15 = vst [vmem:[#allocation2] sm:$0x1] %v14_v0 }
   0x3   :  { %16 = vsyncpa [#allocation4], 0 }
   0x4   :  { %18 = vsyncpa [#allocation4 + $0x1], 0  ;;  %s976_s11 = smov 0   ;;  %s978_s12 = smov 0  }
   0x5   :  { %s980_s13 = smov 0   ;;  %s982_s14 = smov 0  }
   0x6 LB: > { %s777_s8 = sadd.s32 4294967295, %s920_s14   ;;  %s778_s15 = sadd.s32 4294967294, %s920_s14   ;;  %s920_s14 = sphi %s982_s14, %s1132_s14   ;;  %s916_s13 = sphi %s980_s13, %s1131_s13   ;;  %s912_s12 = sphi %s978_s12, %s1130_s12   ;;  %s908_s11 = sphi %s976_s11, %s1129_s11  }
   0x7   : > { %s999_s16 = sadd.s32 1, %s920_s14   ;;  %s225_s17 = sadd.s32 1, %s916_s13 }
   0x8   : > { %s222_s18 = ssub.s32 %s920_s14, %s999_s16  ;;  %p235_p0 = scmp.ne.s32.totalorder %s916_s13, %s912_s12 }
   0x9   : > { %p223_p1 = scmp.eq.s32.totalorder %s222_s18, 0  ;;  %p236_p2 = scmp.eq.s32.totalorder %s777_s8, 1 }
   0xa   : > { %p241_p3 = scmp.ne.s32.totalorder %s912_s12, %s908_s11  ;;  %p242_p4 = scmp.eq.s32.totalorder %s778_s15, 1 }
   0xb   : > { %s1011_s19 = scalar_select %p223_p1, %s916_s13, %s225_s17  }
   0xc   : > { %p1013_p5 = por %p236_p2, %p235_p0  ;;  %p1017_p6 = por %p242_p4, %p241_p3 }
   0xd   : > { %p781_p7 = scmp.ge.s32.totalorder %s920_s14, 1  ;;  %p292_p8 = scmp.lt.s32.totalorder %s920_s14, 3 }
   0xf   : > { %p293_p9 = pnand %p781_p7, %p292_p8 }
  0x10   : > { %s1049_s25 = sshll.u32 (!%p293_p9), %s777_s8, 2  ;;  %s324_s30 = sand.u32 (!%p293_p9), 1, %s912_s12  }
  0x11   : > { %296 = sbr.rel (%p293_p9) target bundleno = 497 (0x1f1), region = 56  ;;  %p328_p10 = scmp.lt.s32.totalorder (!%p293_p9), %s1049_s25, 7 }
  0x12   : > { %s782_s10 = sshll.u32 (!%p293_p9), %s324_s30, 2  ;;  %s717_s18 = scalar_lea.hbm (!%p293_p9), %s1126_s9, %s1049_s25 }
  0x13   : > { %s326_s22 = scalar_lea.vmem (!%p293_p9), [#allocation3], %s782_s10  ;;  %s721_s24 = sshll.u32 (!%p293_p9), %s717_s18, 4  ;;  %s722_s24 = int_to_ptr.hbm [resolvable:$true] %s721_s24 }
  0x14   : > { %s719_s23 = sshll.u32 (!%p293_p9), %s326_s22, 4  ;;  %s878_s8 = scalar_lea.hbm (!%p293_p9), %s1126_s9, 8  ;;  %s720_s23 = int_to_ptr.vmem [resolvable:$true] %s719_s23 }
  0x16   : > { %v364_v1 = vld [vmem:[%s1119_s2] sm:$0xff]  ;;  %v922_v3 = vmov 0   ;;  %v365_v4 = vld [vmem:[%s1119_s2 + $0x8] sm:$0xff]  ;;  %s329_s26 = scalar_select %p328_p10, %s1049_s25, 7  ;;  %v402_v22 = vld [vmem:[%s1121_s4 + $0x10] sm:$0xff]  ;;  %vm434_vm0 = vcmask 130048  }
  0x17   : > { %v335_v2 = vld [vmem:[%s1118_s1] sm:$0xff]  ;;  %856 = vset.pattern.permute.xlu1 %v922_v3  ;;  %855 = vset.pattern.permute.xlu0 %v922_v3  ;;  %v336_v5 = vld [vmem:[%s1118_s1 + $0x8] sm:$0xff]  ;;  %v403_v37 = vld [vmem:[%s1121_s4 + $0x18] sm:$0xff]  ;;  %vm560_vm1 = vcmask 261120   ;;  %vm694_vm2 = vcmask 1040384   ;;  %vm696_vm3 = vcmask 1042434  }
  0x18   : > { %368 = vperm.xlu1 %856, %v364_v1   ;;  %339 = vperm.xlu0 %855, %v335_v2   ;;  %v401_v6 = vld [vmem:[%s1121_s4 + $0x8] sm:$0xff]  ;;  %v400_v7 = vld [vmem:[%s1121_s4] sm:$0xff]  ;;  %s330_s29 = scalar_lea.vmem %s1117_s0, %s329_s26  ;;  %vm698_vm4 = vcmask 1041408   ;;  %s707_s25 = scalar_lea.sflag [#allocation4], %s324_s30 }
  0x19   : > { %857 = vset.pattern.permute.xlu2 %v922_v3  ;;  %v628_v8 = vld [vmem:[%s1124_s7] sm:$0xff]  ;;  %v544_v9 = vld [vmem:[%s1123_s6 + $0x8] sm:$0xff]  ;;  %s872_s26 = sshra.s32 %s722_s24, 4  ;;  %s873_s26 = int_to_ptr.hbm [resolvable:$true] %s872_s26 }
  0x1a   : > { %v676_v10 = vld [vmem:[#allocation2] sm:$0x1]  ;;  %416 = vperm.xlu2 %857, %v402_v22   ;;  %v629_v52 = vld [vmem:[%s1124_s7 + $0x8] sm:$0xff]  ;;  %s874_s27 = scalar_lea.hbm %s873_s26, 4  ;;  %p879_p0 = scmp.lt.s32.totalorder %s873_s26, %s1126_s9 }
  0x1b   : > { %v334_v11 = vld [vmem:[%s330_s29] sm:$0xf]  ;;  %v813_v53 = vld [vmem:[%s1120_s3 + $0x8] sm:$0xff]  ;;  %p875_p11 = scmp.ne.s32.totalorder %s873_s26, %s874_s27  ;;  %p880_p1 = scmp.lt.s32.totalorder %s878_s8, %s874_s27 }
  0x1c   : > { %v348_v14 = vperm.slane %v334_v11, 0  ;;  %v349_v15 = vperm.slane %v334_v11, 1  ;;  %v350_v16 = vperm.slane %v334_v11, 2  ;;  %v351_v17 = vperm.slane %v334_v11, 3  ;;  %v812_v50 = vld [vmem:[%s1120_s3] sm:$0xff] }
  0x1d   : > { %v543_v51 = vld [vmem:[%s1123_s6] sm:$0xff]  ;;  %p876_p12 = pnand %p875_p11, %p1013_p5  ;;  %p881_p2 = por %p880_p1, %p879_p0 }
  0x1f   : > { %p877_p13 = pneg %p876_p12 }
  0x20   : > { %373 = vperm.xlu1 %856, %v365_v4   ;;  %344 = vperm.xlu0 %855, %v336_v5  }
  0x21   : > { %p882_p3 = pnand %p881_p2, %p877_p13 }
  0x22   : > { %421 = vperm.xlu2 %857, %v403_v37  }
  0x28   : > { %411 = vperm.xlu1 %856, %v401_v6   ;;  %406 = vperm.xlu0 %855, %v400_v7  }
  0x2a   : > { %547 = vperm.xlu2 %857, %v543_v51  }
  0x30   : > { %632 = vperm.xlu1 %856, %v628_v8   ;;  %552 = vperm.xlu0 %855, %v544_v9  }
  0x32   : > { %637 = vperm.xlu2 %857, %v629_v52  }
  0x38   : > { %679 = vperm.xlu0 %855, %v676_v10  }
  0x74   : > { %v417_v60 = vpop.permute.xlu2 %416 }
  0x7c   : > { %v422_v2 = vpop.permute.xlu2 %421 }
  0x8a   : > { %v369_v12 = vpop.permute.xlu1 %368  ;;  %v340_v13 = vpop.permute.xlu0 %339 }
  0x8b   : > { %v356_v18 = vmul.f32 %v348_v14, %v340_v13  ;;  %v357_v19 = vmul.f32 %v349_v15, %v340_v13  ;;  %v358_v20 = vmul.f32 %v350_v16, %v340_v13  ;;  %v359_v21 = vmul.f32 %v351_v17, %v340_v13 }
  0x8d   : > { %v376_v24 = vadd.f32 %v369_v12, %v356_v18  ;;  %v377_v25 = vadd.f32 %v369_v12, %v357_v19  ;;  %v378_v26 = vadd.f32 %v369_v12, %v358_v20  ;;  %v379_v27 = vadd.f32 %v369_v12, %v359_v21 }
  0x8f   : > { %v384_v38 = vmax.f32 %v376_v24, 0.0  ;;  %v385_v39 = vmax.f32 %v377_v25, 0.0  ;;  %v386_v40 = vmax.f32 %v378_v26, 0.0  ;;  %v387_v41 = vmax.f32 %v379_v27, 0.0 }
  0x92   : > { %v345_v23 = vpop.permute.xlu0 %344  ;;  %v374_v32 = vpop.permute.xlu1 %373 }
  0x93   : > { %v360_v28 = vmul.f32 %v348_v14, %v345_v23  ;;  %v361_v29 = vmul.f32 %v349_v15, %v345_v23  ;;  %v362_v30 = vmul.f32 %v350_v16, %v345_v23  ;;  %v363_v31 = vmul.f32 %v351_v17, %v345_v23 }
  0x95   : > { %v380_v33 = vadd.f32 %v374_v32, %v360_v28  ;;  %v381_v34 = vadd.f32 %v374_v32, %v361_v29  ;;  %v382_v35 = vadd.f32 %v374_v32, %v362_v30  ;;  %v383_v36 = vadd.f32 %v374_v32, %v363_v31 }
  0x97   : > { %v388_v42 = vmax.f32 %v380_v33, 0.0  ;;  %v389_v43 = vmax.f32 %v381_v34, 0.0  ;;  %v390_v44 = vmax.f32 %v382_v35, 0.0  ;;  %v391_v45 = vmax.f32 %v383_v36, 0.0 }
  0x99   : > { %v396_v46 = vpack.c.bf16 %v388_v42, %v384_v38  ;;  %v397_v47 = vpack.c.bf16 %v389_v43, %v385_v39  ;;  %v398_v48 = vpack.c.bf16 %v390_v44, %v386_v40  ;;  %v399_v49 = vpack.c.bf16 %v391_v45, %v387_v41  ;;  %v814_v42 = vld [vmem:[%s1122_s5] sm:$0xff] }
  0x9a   : > { %v412_v1 = vpop.permute.xlu1 %411  ;;  %v407_v9 = vpop.permute.xlu0 %406 }
  0x9b   : > { %448 = vmatpush.bf16.msra.mxu0 %v396_v46  ;;  %467 = vmatpush.bf16.msra.mxu1 %v397_v47 }
  0x9c   : > { %486 = vmatpush.bf16.msra.mxu2 %v398_v48  ;;  %505 = vmatpush.bf16.msra.mxu3 %v399_v49 }
  0x9e   : > { %792 = vmatmul.msk.bf16.vlgmr.msra.gmra.mxu0 %vm434_vm0, %v812_v50  ;;  %794 = vmatmul.msk.bf16.vlgmr.msra.gmra.mxu1 %vm434_vm0, %v812_v50 }
  0x9f   : > { %796 = vmatmul.msk.bf16.vlgmr.msra.gmra.mxu2 %vm434_vm0, %v812_v50  ;;  %798 = vmatmul.msk.bf16.vlgmr.msra.gmra.mxu3 %vm434_vm0, %v812_v50 }
  0xae   : > { %793 = vmatmul.msk.bf16.gmra.mxu0 %vm434_vm0, %v813_v53  ;;  %795 = vmatmul.msk.bf16.gmra.mxu1 %vm434_vm0, %v813_v53 }
  0xaf   : > { %797 = vmatmul.msk.bf16.gmra.mxu2 %vm434_vm0, %v813_v53  ;;  %799 = vmatmul.msk.bf16.gmra.mxu3 %vm434_vm0, %v813_v53  ;;  %v548_v53 = vpop.permute.xlu2 %547 }
 0x11b   : > { %v450_v54 = vpop.f32.mrf.mxu0  ;;  %v469_v55 = vpop.f32.mrf.mxu1 }
 0x11c   : > { %v451_v14 = vadd.f32 %v450_v54, %v407_v9  ;;  %v470_v15 = vadd.f32 %v469_v55, %v407_v9 }
 0x11e   : > { %v517_v26 = vmax.f32 %v451_v14, 0.0  ;;  %v518_v27 = vmax.f32 %v470_v15, 0.0 }
 0x122   : > { %v488_v56 = vpop.f32.mrf.mxu2  ;;  %v507_v57 = vpop.f32.mrf.mxu3 }
 0x123   : > { %v452_v58 = vpop.f32.mrf.mxu0  ;;  %v471_v59 = vpop.f32.mrf.mxu1  ;;  %v489_v34 = vadd.f32 %v488_v56, %v407_v9  ;;  %v508_v35 = vadd.f32 %v507_v57, %v407_v9 }
 0x124   : > { %v453_v10 = vadd.f32 %v452_v58, %v412_v1  ;;  %v472_v11 = vadd.f32 %v471_v59, %v412_v1  ;;  %v553_v56 = vpop.permute.xlu0 %552 }
 0x125   : > { %v519_v47 = vmax.f32 %v489_v34, 0.0  ;;  %v520_v48 = vmax.f32 %v508_v35, 0.0 }
 0x126   : > { %v521_v20 = vmax.f32 %v453_v10, 0.0  ;;  %v522_v21 = vmax.f32 %v472_v11, 0.0 }
 0x128   : > { %v535_v36 = vpack.c.bf16 %v521_v20, %v517_v26  ;;  %v536_v37 = vpack.c.bf16 %v522_v21, %v518_v27 }
 0x12a   : > { %v490_v61 = vpop.f32.mrf.mxu2  ;;  %v509_v62 = vpop.f32.mrf.mxu3 }
 0x12b   : > { %v455_v63 = vpop.f32.mrf.mxu0  ;;  %v474_v0 = vpop.f32.mrf.mxu1  ;;  %v491_v30 = vadd.f32 %v490_v61, %v412_v1  ;;  %v510_v31 = vadd.f32 %v509_v62, %v412_v1 }
 0x12c   : > { %v456_v3 = vadd.f32 %v455_v63, %v417_v60  ;;  %v475_v4 = vadd.f32 %v474_v0, %v417_v60  ;;  %v633_v63 = vpop.permute.xlu1 %632  ;;  %v638_v0 = vpop.permute.xlu2 %637 }
 0x12d   : > { %v523_v43 = vmax.f32 %v491_v30, 0.0  ;;  %v524_v44 = vmax.f32 %v510_v31, 0.0 }
 0x12e   : > { %v525_v16 = vmax.f32 %v456_v3, 0.0  ;;  %v526_v17 = vmax.f32 %v475_v4, 0.0 }
 0x12f   : > { %v537_v49 = vpack.c.bf16 %v523_v43, %v519_v47  ;;  %v538_v50 = vpack.c.bf16 %v524_v44, %v520_v48 }
 0x132   : > { %v493_v5 = vpop.f32.mrf.mxu2  ;;  %v512_v6 = vpop.f32.mrf.mxu3 }
 0x133   : > { %v457_v7 = vpop.f32.mrf.mxu0  ;;  %v476_v8 = vpop.f32.mrf.mxu1  ;;  %v494_v24 = vadd.f32 %v493_v5, %v417_v60  ;;  %v513_v25 = vadd.f32 %v512_v6, %v417_v60 }
 0x134   : > { %v458_v12 = vadd.f32 %v457_v7, %v422_v2  ;;  %v477_v13 = vadd.f32 %v476_v8, %v422_v2 }
 0x135   : > { %v527_v38 = vmax.f32 %v494_v24, 0.0  ;;  %v528_v39 = vmax.f32 %v513_v25, 0.0 }
 0x136   : > { %v529_v18 = vmax.f32 %v458_v12, 0.0  ;;  %v530_v19 = vmax.f32 %v477_v13, 0.0 }
 0x138   : > { %v539_v22 = vpack.c.bf16 %v529_v18, %v525_v16  ;;  %v540_v23 = vpack.c.bf16 %v530_v19, %v526_v17 }
 0x13a   : > { %v495_v28 = vpop.f32.mrf.mxu2  ;;  %v514_v29 = vpop.f32.mrf.mxu3  ;;  %570 = vmatpush.bf16.msrb.mxu0 %v539_v22  ;;  %584 = vmatpush.bf16.msrb.mxu1 %v540_v23 }
 0x13b   : > { %v496_v32 = vadd.f32 %v495_v28, %v422_v2  ;;  %v515_v33 = vadd.f32 %v514_v29, %v422_v2 }
 0x13d   : > { %v531_v40 = vmax.f32 %v496_v32, 0.0  ;;  %v532_v41 = vmax.f32 %v515_v33, 0.0 }
 0x13e   : > { %571 = vmatpush.bf16.msrb.mxu0 %v535_v36  ;;  %585 = vmatpush.bf16.msrb.mxu1 %v536_v37 }
 0x13f   : > { %v541_v45 = vpack.c.bf16 %v531_v40, %v527_v38  ;;  %v542_v46 = vpack.c.bf16 %v532_v41, %v528_v39  ;;  %v680_v40 = vpop.permute.xlu0 %679 }
 0x140   : > { %v682_v44 = vperm.slane %v680_v40, 0 }
 0x141   : > { %598 = vmatpush.bf16.msrb.mxu2 %v541_v45  ;;  %612 = vmatpush.bf16.msrb.mxu3 %v542_v46 }
 0x142   : > { %804 = vmatmul.msk.bf16.vlgmr.msrb.gmra.mxu0 %vm560_vm1, %v814_v42  ;;  %805 = vmatmul.msk.bf16.vlgmr.msrb.gmra.mxu1 %vm560_vm1, %v814_v42 }
 0x145   : > { %599 = vmatpush.bf16.msrb.mxu2 %v537_v49  ;;  %613 = vmatpush.bf16.msrb.mxu3 %v538_v50 }
 0x148   : > { %806 = vmatmul.msk.bf16.vlgmr.msrb.gmra.mxu2 %vm560_vm1, %v814_v42  ;;  %807 = vmatmul.msk.bf16.vlgmr.msrb.gmra.mxu3 %vm560_vm1, %v814_v42 }
 0x1bf   : > { %v573_v51 = vpop.f32.mrf.mxu0  ;;  %v587_v52 = vpop.f32.mrf.mxu1 }
 0x1c0   : > { %v574_v54 = vadd.f32 %v573_v51, %v548_v53  ;;  %v588_v55 = vadd.f32 %v587_v52, %v548_v53 }
 0x1c2   : > { %v620_v59 = vmax.f32 %v574_v54, 0.0  ;;  %v621_v60 = vmax.f32 %v588_v55, 0.0  ;;  %v701_v54 = vlaneseq }
 0x1c4   : > { %v640_v5 = vmul.f32 %v633_v63, %v620_v59  ;;  %v641_v6 = vmul.f32 %v633_v63, %v621_v60  ;;  %vm703_vm5 = vcmp.lt.s32.totalorder %v701_v54, 512 }
 0x1c7   : > { %v575_v57 = vpop.f32.mrf.mxu0  ;;  %v589_v58 = vpop.f32.mrf.mxu1 }
 0x1c8   : > { %v576_v61 = vadd.f32 %v575_v57, %v553_v56  ;;  %v590_v62 = vadd.f32 %v589_v58, %v553_v56 }
 0x1ca   : > { %v624_v1 = vmax.f32 %v576_v61, 0.0  ;;  %v625_v2 = vmax.f32 %v590_v62, 0.0 }
 0x1cb   : > { %v601_v3 = vpop.f32.mrf.mxu2  ;;  %v615_v4 = vpop.f32.mrf.mxu3 }
 0x1cc   : > { %v644_v7 = vmul.f32 %v638_v0, %v624_v1  ;;  %v645_v8 = vmul.f32 %v638_v0, %v625_v2  ;;  %v602_v11 = vadd.f32 %v601_v3, %v548_v53  ;;  %v616_v13 = vadd.f32 %v615_v4, %v548_v53 }
 0x1ce   : > { %v648_v9 = vadd.f32 %v644_v7, %v640_v5  ;;  %v655_v10 = vadd.f32 %v645_v8, %v641_v6  ;;  %v622_v16 = vmax.f32 %v602_v11, 0.0  ;;  %v623_v20 = vmax.f32 %v616_v13, 0.0 }
 0x1d0   : > { %v656_v12 = vrot.slane %v655_v10, 4  ;;  %v649_v14 = vrot.slane %v648_v9, 4  ;;  %v642_v26 = vmul.f32 %v633_v63, %v622_v16  ;;  %v643_v28 = vmul.f32 %v633_v63, %v623_v20 }
 0x1d2   : > { %v657_v15 = vadd.f32 %v656_v12, %v655_v10  ;;  %v650_v23 = vadd.f32 %v649_v14, %v648_v9 }
 0x1d3   : > { %v603_v17 = vpop.f32.mrf.mxu2  ;;  %v617_v18 = vpop.f32.mrf.mxu3 }
 0x1d4   : > { %v658_v19 = vrot.slane %v657_v15, 2  ;;  %v604_v21 = vadd.f32 %v603_v17, %v553_v56  ;;  %v618_v22 = vadd.f32 %v617_v18, %v553_v56  ;;  %v651_v31 = vrot.slane %v650_v23, 2 }
 0x1d6   : > { %v626_v24 = vmax.f32 %v604_v21, 0.0  ;;  %v627_v25 = vmax.f32 %v618_v22, 0.0  ;;  %v659_v27 = vadd.f32 %v658_v19, %v657_v15  ;;  %v652_v37 = vadd.f32 %v651_v31, %v650_v23 }
 0x1d8   : > { %v646_v29 = vmul.f32 %v638_v0, %v626_v24  ;;  %v647_v30 = vmul.f32 %v638_v0, %v627_v25  ;;  %v660_v34 = vrot.slane %v659_v27, 1  ;;  %v653_v45 = vrot.slane %v652_v37, 1 }
 0x1da   : > { %v662_v32 = vadd.f32 %v646_v29, %v642_v26  ;;  %v669_v33 = vadd.f32 %v647_v30, %v643_v28  ;;  %v661_v41 = vadd.f32 %v660_v34, %v659_v27  ;;  %v654_v51 = vadd.f32 %v653_v45, %v652_v37 }
 0x1dc   : > { %v663_v35 = vrot.slane %v662_v32, 4  ;;  %v670_v36 = vrot.slane %v669_v33, 4  ;;  %v684_v50 = vadd.f32 %v682_v44, %v661_v41  ;;  %v683_v58 = vadd.f32 %v682_v44, %v654_v51 }
 0x1de   : > { %v664_v38 = vadd.f32 %v663_v35, %v662_v32  ;;  %v671_v39 = vadd.f32 %v670_v36, %v669_v33  ;;  %v691_v57 = vrot.slane %v684_v50, 7 }
 0x1e0   : > { %v665_v42 = vrot.slane %v664_v38, 2  ;;  %v672_v43 = vrot.slane %v671_v39, 2  ;;  %v695_v61 = vsel %vm694_vm2, %v683_v58, %v691_v57 }
 0x1e2   : > { %v666_v46 = vadd.f32 %v665_v42, %v664_v38  ;;  %v673_v47 = vadd.f32 %v672_v43, %v671_v39 }
 0x1e4   : > { %v667_v48 = vrot.slane %v666_v46, 1  ;;  %v674_v49 = vrot.slane %v673_v47, 1 }
 0x1e6   : > { %v668_v52 = vadd.f32 %v667_v48, %v666_v46  ;;  %v675_v53 = vadd.f32 %v674_v49, %v673_v47 }
 0x1e8   : > { %v685_v55 = vadd.f32 %v682_v44, %v668_v52  ;;  %v686_v56 = vadd.f32 %v682_v44, %v675_v53 }
 0x1ea   : > { %v692_v59 = vrot.slane %v685_v55, 6  ;;  %v693_v60 = vrot.slane %v686_v56, 5 }
 0x1ec   : > { %v697_v62 = vsel %vm696_vm3, %v692_v59, %v693_v60 }
 0x1ed   : > { %v699_v63 = vsel %vm698_vm4, %v695_v61, %v697_v62 }
 0x1ee   : > { %705 = vst.msk [vmem:[%s326_s22] sm:$0xf] %vm703_vm5, %v699_v63 }
 0x1ef   : > { %885 = shalt.err (!%p882_p3)
}
 0x1f0   : > { %815 = dma.vmem_to_hbm [thread:$0]  (%p1013_p5), %s720_s23, 64, %s722_s24, %s707_s25  }
 0x1f1 PF: > { %p821_p4 = scmp.ge.s32.totalorder %s920_s14, 2  ;;  %s733_s30 = sand.u32 1, %s908_s11  }
 0x1f2   : > { %s734_s17 = scalar_lea.sflag [#allocation4], %s733_s30 }
 0x1f3   : > { %p818_p7 = pnand %p821_p4, %p1017_p6 }
 0x1f5   : > { %p819_p8 = pneg %p818_p7 }
 0x1f7   : > { %903 = dma.done.wait (%p819_p8), %s734_s17, 64  }
 0x1f8   : > { %905 = vsyncadd (%p819_p8), %s734_s17, 4294967232  ;;  %p21_p9 = scmp.ge.s32.totalorder %s999_s16, 4   ;;  %s1129_s11 = smov %s912_s12 }
 0x1f9   : > { %s1130_s12 = smov %s916_s13  ;;  %s1131_s13 = smov %s1011_s19 }
 0x1fa   : > { %s1132_s14 = smov %s999_s16  ;;  %23 = sbr.rel (!%p21_p9) target bundleno = 6 (0x6), region = 91 }
 0x1ff   :  { %740 = vsyncpa [#allocation4], 1 }
 0x200   :  { %742 = vsyncpa [#allocation4 + $0x1], 1 }

</bundles_post_ra>
